<compile_context>
chip_gen: v6e
topology: v6e:2x2x1
jax: 0.10.0
libtpu: 0.0.40
codegen_flags: <defaults>
</compile_context>

<pallas_src>
import jax
import jax.numpy as jnp
from jax.experimental import pallas as pl
from jax.experimental.pallas import tpu as pltpu


def _silu_kernel(x_ref, o_ref):
    # Upcast to f32 (free: DMA-bound; matches PyTorch opmath for half dtypes
    # and sidesteps v5e's lack of bf16 VPU/EUP).
    x = x_ref[...].astype(jnp.float32)
    # x * sigmoid(x) == x / (1 + exp(-x)).  exp -> EUP.  For very negative x,
    # exp(-x) -> inf and x/inf -> 0, so no NaN; for very positive x the
    # denominator is 1.  Exact divide kept for accuracy (approx reciprocal is
    # a v7x-only micro-opt that trades a few ULP for a free EUP slot).
    o_ref[...] = (x / (1.0 + jnp.exp(-x))).astype(o_ref.dtype)


_MIN_SUBLANES = {4: 8, 2: 16, 1: 32}       # itemsize -> minimum sublane tiling
_LANE_CANDIDATES = (1024, 512, 256, 128)   # lane-dense last dims (multiples of 128)
_MAX_BLOCK_BYTES = 8 * 1024 * 1024         # per-block ceiling (>=85% roofline already at 2 MiB)
_VMEM_HEADROOM = 16 * 1024 * 1024          # leave room for compiler scratch
_FALLBACK_VMEM_CAP = 64 * 1024 * 1024      # assume smallest generation (v7x per-TC)


def _vmem_budget_bytes():
    """Scoped-VMEM budget for this kernel's pipeline, per TensorCore."""
    try:
        cap = int(pltpu.get_tpu_info().vmem_capacity_bytes)
    except Exception:
        cap = _FALLBACK_VMEM_CAP
    # Never request more than 64 MiB of scoped VMEM; always keep headroom.
    return max(16 * 1024 * 1024, min(cap - _VMEM_HEADROOM, 64 * 1024 * 1024))


def silu(x):
    """Elementwise SiLU (x * sigmoid(x)) on an arbitrary-shaped array."""
    orig_shape = x.shape
    dtype = x.dtype
    itemsize = jnp.dtype(dtype).itemsize
    n = x.size
    total_bytes = n * itemsize

    # Pick the widest lane-dense last dim that divides n exactly (pad-free).
    lane = None
    for cand in _LANE_CANDIDATES:
        if n > 0 and n % cand == 0:
            lane = cand
            break

    if lane is None:
        # Ragged / tiny / empty sizes: one fused XLA elementwise pass beats
        # pad + kernel + slice (3 HBM passes) for a memory-bound op.
        return x * jax.nn.sigmoid(x)

    rows = n // lane
    x2d = jnp.reshape(x, (rows, lane))

    # Chip-aware block rows: 4 x block bytes (in + out, double-buffered) must
    # fit the scoped-VMEM budget; cap individual blocks at ~8 MiB.
    vmem_budget = _vmem_budget_bytes()
    block_bytes = min(_MAX_BLOCK_BYTES, vmem_budget // 4)
    min_rows = _MIN_SUBLANES.get(itemsize, 8)
    tile_rows = max(
        min_rows,
        (block_bytes // (lane * itemsize)) // min_rows * min_rows,
    )

    # Guarantee enough blocks for megacore sharding on v7x (2 TCs): >=4 blocks
    # for >=4 MiB arrays, >=2 blocks for >=2 MiB.  No effect on tiny inputs
    # (where a single block avoids per-step overhead) or on single-TC chips.
    if total_bytes >= 4 * 1024 * 1024:
        min_blocks = 4
    elif total_bytes >= 2 * 1024 * 1024:
        min_blocks = 2
    else:
        min_blocks = 1
    if min_blocks > 1 and rows >= min_blocks * min_rows:
        cap_rows = max(min_rows, (rows // min_blocks) // min_rows * min_rows)
        tile_rows = min(tile_rows, cap_rows)

    if rows <= tile_rows:
        # Single block equal to the full array: always a legal block shape.
        block_shape = (rows, lane)
        grid = (1,)
    else:
        # (8,128)-aligned blocks; the ragged final block is masked by Pallas.
        block_shape = (tile_rows, lane)
        grid = (pl.cdiv(rows, tile_rows),)

    out2d = pl.pallas_call(
        _silu_kernel,
        out_shape=jax.ShapeDtypeStruct((rows, lane), dtype),
        grid_spec=pltpu.PrefetchScalarGridSpec(
            num_scalar_prefetch=0,
            grid=grid,
            in_specs=[pl.BlockSpec(block_shape, lambda i: (i, 0))],
            out_specs=pl.BlockSpec(block_shape, lambda i: (i, 0)),
        ),
        compiler_params=pltpu.CompilerParams(
            dimension_semantics=("parallel",),
            vmem_limit_bytes=int(vmem_budget),
        ),
        cost_estimate=pl.CostEstimate(
            flops=4 * n,
            transcendentals=n,
            bytes_accessed=2 * total_bytes,
        ),
    )(x2d)

    return jnp.reshape(out2d, orig_shape)


if __name__ == "__main__":
    def ref_silu(v):
        vf = v.astype(jnp.float32)
        return (vf * (1.0 / (1.0 + jnp.exp(-vf)))).astype(v.dtype)

    # NCHW, consistent with how SiLU is used inside EfficientNet conv blocks.
    x = jax.random.normal(jax.random.PRNGKey(0), (2, 4, 16, 16), dtype=jnp.float32)
    out = jax.block_until_ready(silu(x))
    assert out.shape == x.shape and out.dtype == x.dtype
    assert jnp.max(jnp.abs(out - ref_silu(x))) < 1e-5

    # Ragged (non-multiple-of-128) size exercises the fused XLA fallback path.
    x2 = jax.random.normal(jax.random.PRNGKey(0), (3, 5, 7), dtype=jnp.float32)
    out2 = jax.block_until_ready(silu(x2))
    assert out2.shape == x2.shape and out2.dtype == x2.dtype
    assert jnp.max(jnp.abs(out2 - ref_silu(x2))) < 1e-5

    # bf16 exercises the in-kernel f32 upcast (PyTorch opmath parity).
    x3 = jax.random.normal(jax.random.PRNGKey(0), (4, 8, 16, 32), dtype=jnp.bfloat16)
    out3 = jax.block_until_ready(silu(x3))
    assert out3.shape == x3.shape and out3.dtype == x3.dtype
    assert jnp.max(jnp.abs(out3.astype(jnp.float32)
                           - ref_silu(x3).astype(jnp.float32))) < 2e-2

    print("KERNEL_OK")
</pallas_src>

<mosaic_0001>
module attributes {stable_mosaic.version = 11 : i64} {
  func.func @_silu_kernel(%arg0: i32, %arg1: memref<2x1024xf32, #tpu.memory_space<vmem>>, %arg2: memref<2x1024xf32, #tpu.memory_space<vmem>>) attributes {dimension_semantics = [#tpu.dimension_semantics<parallel>], iteration_bounds = array<i64: 1>, scalar_prefetch = 0 : i64, scratch_operands = 0 : i64, tpu.core_type = #tpu.core_type<tc>, window_params = [{transform_indices = @transform_0, window_bounds = array<i64: 2, 1024>}, {transform_indices = @transform_1, window_bounds = array<i64: 2, 1024>}]} {
    %c0 = arith.constant 0 : index
    %c0_0 = arith.constant 0 : index
    %0 = vector.load %arg1[%c0, %c0_0] : memref<2x1024xf32, #tpu.memory_space<vmem>>, vector<2x1024xf32>
    %cst = arith.constant 0.000000e+00 : f32
    %1 = vector.broadcast %cst : f32 to vector<2x1024xf32>
    %2 = arith.subf %1, %0 : vector<2x1024xf32>
    %3 = math.exp %2 : vector<2x1024xf32>
    %cst_1 = arith.constant 1.000000e+00 : f32
    %4 = vector.broadcast %cst_1 : f32 to vector<2x1024xf32>
    %5 = arith.addf %4, %3 : vector<2x1024xf32>
    %6 = arith.divf %0, %5 : vector<2x1024xf32>
    %c0_2 = arith.constant 0 : index
    %c0_3 = arith.constant 0 : index
    %7 = vector.load %arg2[%c0_2, %c0_3] : memref<2x1024xf32, #tpu.memory_space<vmem>>, vector<2x1024xf32>
    tpu.vector_store %arg2[%c0_2, %c0_3], %6 {strides = array<i32>} : memref<2x1024xf32, #tpu.memory_space<vmem>>, vector<2x1024xf32>,
    return
  }
  func.func @transform_0(%arg0: i32) -> (i32, i32) {
    %c0_i32 = arith.constant 0 : i32
    %c0_i32_0 = arith.constant 0 : i32
    return %arg0, %c0_i32 : i32, i32
  }
  func.func @transform_1(%arg0: i32) -> (i32, i32) {
    %c0_i32 = arith.constant 0 : i32
    %c0_i32_0 = arith.constant 0 : i32
    return %arg0, %c0_i32 : i32, i32
  }
}

</mosaic_0001>

<bundles_post_ra>
// kernel: tpu_custom_call.1
= control target key start
LH: loop header
LB: loop body
LE: loop exit
PB: predicated region body
PF: predicated region fallthrough
CT: control target
= control target key end

     0   :  { %6 = vsyncpa [#allocation3], 0  ;;  %s124_s0 = inlined_call_operand.hbm [shape: f32[2,1024], index: 0, kind: input, shape index: {}]   ;;  %s125_s1 = inlined_call_operand.hbm [shape: f32[2,1024], index: 1, kind: output, shape index: {}]  }
   0x1   :  { %7 = vsyncpa [#allocation4], 0  ;;  %s106_s6 = smov [#allocation2]  }
   0x2   :  { %s14_s7 = sshll.u32 %s106_s6, 4  ;;  %s15_s7 = int_to_ptr.vmem [resolvable:$true] %s14_s7 }
   0x3   :  { %s70_s8 = scalar_lea.vmem %s15_s7, 256  ;;  %p75_p1 = scmp.lt.s32.totalorder %s15_s7, %s15_s7 }
   0x4   :  { %p71_p0 = scmp.ne.s32.totalorder %s15_s7, %s70_s8  ;;  %p76_p2 = scmp.lt.s32.totalorder %s70_s8, %s70_s8 }
   0x6   :  { %p77_p3 = por %p76_p2, %p75_p1 }
   0x8   :  { %p78_p4 = pnand %p77_p3, %p71_p0 }
   0xa   :  { %81 = shalt.err (!%p78_p4)
}
   0xb   :  { %17 = dma.hbm_to_vmem [thread:$0]  %s124_s0, 256, %s15_s7, [#allocation3]  }
   0xc   :  { %102 = dma.done.wait [#allocation3], 256  }
   0xd   :  { %103 = vsyncadd [#allocation3], 4294967040  ;;  %v21_v0 = vld [vmem:[#allocation2] sm:$0xff]  ;;  %v22_v1 = vld [vmem:[#allocation2 + $0x8] sm:$0xff]  ;;  %s107_s11 = smov [#allocation5]  }
   0xe   :  { %v23_v2 = vsub.f32 0.0, %v21_v0  ;;  %v24_v3 = vsub.f32 0.0, %v22_v1  ;;  %s43_s12 = sshll.u32 %s107_s11, 4  ;;  %s44_s12 = int_to_ptr.vmem [resolvable:$true] %s43_s12 }
   0xf   :  { %s82_s0 = scalar_lea.vmem %s44_s12, 256  ;;  %p87_p6 = scmp.lt.s32.totalorder %s44_s12, %s44_s12 }
  0x10   :  { %v25_v4 = vmul.f32 1.442695, %v23_v2  ;;  %v27_v5 = vmul.f32 1.442695, %v24_v3  ;;  %p83_p5 = scmp.ne.s32.totalorder %s44_s12, %s82_s0  ;;  %p88_p7 = scmp.lt.s32.totalorder %s82_s0, %s82_s0 }
  0x12   :  { %54 = vpow2.f32 %v25_v4  ;;  %p89_p8 = por %p88_p7, %p87_p6 }
  0x13   :  { %56 = vpow2.f32 %v27_v5 }
  0x14   :  { %p90_p9 = pnand %p89_p8, %p83_p5 }
  0x1f   :  { %v55_v6 = vpop.eup %54 }
  0x20   :  { %v57_v7 = vpop.eup %56  ;;  %v29_v8 = vadd.f32 1.0, %v55_v6 }
  0x21   :  { %v30_v9 = vadd.f32 1.0, %v57_v7 }
  0x22   :  { %58 = vrcp.f32 %v29_v8 }
  0x23   :  { %60 = vrcp.f32 %v30_v9 }
  0x2f   :  { %v59_v10 = vpop.eup %58 }
  0x30   :  { %v61_v11 = vpop.eup %60  ;;  %v32_v12 = vmul.f32 %v59_v10, %v21_v0 }
  0x31   :  { %v34_v13 = vmul.f32 %v61_v11, %v22_v1 }
  0x32   :  { %35 = vst [vmem:[#allocation5] sm:$0xff] %v32_v12 }
  0x33   :  { %36 = vst [vmem:[#allocation5 + $0x8] sm:$0xff] %v34_v13 }
  0x34   :  { %93 = shalt.err (!%p90_p9)
}
  0x35   :  { %46 = dma.vmem_to_hbm [thread:$0]  %s44_s12, 256, %s125_s1, [#allocation4]  }
  0x36   :  { %104 = dma.done.wait [#allocation4], 256  }
  0x37   :  { %105 = vsyncadd [#allocation4], 4294967040 }
  0x38   :  { %50 = vsyncpa [#allocation3], 1 }
  0x39   :  { %51 = vsyncpa [#allocation4], 1 }

</bundles_post_ra>
